<compile_context>
chip_gen: v7x
topology: tpu7x:2x2x1
jax: 0.10.0
libtpu: 0.0.40
codegen_flags: <defaults>
</compile_context>

<pallas_src>
import functools

import jax
import jax.numpy as jnp
from jax.experimental import pallas as pl
from jax.experimental.pallas import tpu as pltpu


def _fused_upconv_kernel(x_ref, w_ref, b_ref, o_ref, xpad_ref, rhs_ref, *,
                         H, W, Cin, Cout):
    """One batch element of: nearest-2x upsample -> 3x3 conv (pad=1) -> ReLU.

    x_ref    : (1, Cin, H*W)        f32   raw input, spatial flattened on lanes
    w_ref    : (4*Cout, 9*Cin)      bf16  folded weights; row = (phase, cout),
                                          col = (tap9, cin), tap9 = (dr+1)*3 + (dc+1)
    b_ref    : (4*Cout, 1)          f32   bias replicated per phase
    o_ref    : (1, 2, Cout, H*W)    u32   per row-parity output; each u32 packs the
                                          (even col, odd col) bf16 pair
    xpad_ref : (Cin, H*W + 2*W + 2) bf16  scratch: zero-padded flattened input
    rhs_ref  : (9*Cin, H*W)         bf16  scratch: the 9 staged tap planes
    """
    HW = H * W
    OFF = W + 1                      # W+1 zeros on each side cover dr,dc in {-1,0,+1}
    Mp = xpad_ref.shape[1]

    # ---- in-kernel zero pad + f32->bf16 cast (no wrapper pre-pass over the input) ----
    xpad_ref[:, :OFF] = jnp.zeros((Cin, OFF), jnp.bfloat16)
    xpad_ref[:, OFF + HW:] = jnp.zeros((Cin, Mp - OFF - HW), jnp.bfloat16)
    xpad_ref[:, OFF:OFF + HW] = x_ref[0].astype(jnp.bfloat16)

    # Column-wrap keep-masks: flattening rows without per-row pad means a +-1 column
    # shift wraps across rows; zero those lanes to reproduce zero padding exactly.
    col = jax.lax.broadcasted_iota(jnp.int32, (Cin, HW), 1) % W
    keep_l = jnp.where(col == 0, 0.0, 1.0).astype(jnp.bfloat16)       # for dc == -1
    keep_r = jnp.where(col == W - 1, 0.0, 1.0).astype(jnp.bfloat16)   # for dc == +1

    # ---- stage the 9 DISTINCT shifted tap planes once (dedup: 9, not 16) ----
    for t, (dr, dc) in enumerate((dr, dc) for dr in (-1, 0, 1) for dc in (-1, 0, 1)):
        s = OFF + dr * W + dc                       # static lane offset
        plane = xpad_ref[:, s:s + HW]               # shifted static slice (no roll)
        if dc == -1:
            plane = plane * keep_l
        elif dc == 1:
            plane = plane * keep_r
        # NOTE: Cin-row slabs into a 16-sublane-packed bf16 tile are RMW stores for
        # tiny Cin; production Cin (multiples of 16) makes these full-tile writes.
        rhs_ref[t * Cin:(t + 1) * Cin, :] = plane

    # ---- one MXU matmul for all 4 phases: (4*Cout, 9*Cin) @ (9*Cin, H*W) ----
    acc = jnp.dot(w_ref[...], rhs_ref[...], preferred_element_type=jnp.float32)
    acc = jnp.maximum(acc + b_ref[...], 0.0)        # bias + ReLU on the f32 accumulator

    # ---- pack the (even, odd) column-parity pair of each row parity into one u32 ----
    def bf16_bits(v):   # f32 -> bf16 bits (round-to-nearest-even) in the low 16 bits
        u = pltpu.bitcast(v, jnp.uint32)
        return (u + jnp.uint32(0x7FFF) + ((u >> 16) & jnp.uint32(1))) >> 16

    for py in range(2):                                        # row parity
        even = acc[(2 * py) * Cout:(2 * py + 1) * Cout]        # phase (py, px=0)
        odd = acc[(2 * py + 1) * Cout:(2 * py + 2) * Cout]     # phase (py, px=1)
        o_ref[0, py] = bf16_bits(even) | (bf16_bits(odd) << 16)   # lane-dense u32 store


def _vmem_limit_bytes():
    # v5e/v6e have 128 MiB physical VMEM -> raise the scoped limit so larger (tiled)
    # blocks can pipeline; v7x has only 64 MiB, so keep the conservative default there.
    try:
        cap = int(getattr(pltpu.get_tpu_info(), "vmem_capacity_bytes", 0))
    except Exception:
        cap = 0
    return 96 * 1024 * 1024 if cap >= 128 * 1024 * 1024 else 32 * 1024 * 1024


def unet_decoder_block(x_nchw, weight_hwio, bias):
    """UnetDecoderBlock forward: nearest-2x upsample -> 3x3 conv (pad=1) -> ReLU.

    x_nchw      : (N, Cin, H, W)      float32
    weight_hwio : (3, 3, Cin, Cout)   float32 conv weight (HWIO)
    bias        : (Cout,)             float32
    returns     : (N, Cout, 2H, 2W)   float32
    """
    N, Cin, H, W = x_nchw.shape
    Cout = weight_hwio.shape[3]
    HW = H * W
    Mp = HW + 2 * W + 2

    # ---- fold the nearest-2x upsample into the conv (tiny, O(Cin*Cout) prep) ----
    # R9[parity, dr_index, a] = 1 iff original 3x3 row a contributes to the folded tap
    # at row offset dr = dr_index - 1 for that output-row parity.
    R9 = jnp.array([[[1., 0., 0.], [0., 1., 1.], [0., 0., 0.]],
                    [[0., 0., 0.], [1., 1., 0.], [0., 0., 1.]]], dtype=jnp.float32)
    wf = jnp.einsum('pra,qsb,abio->pqrsio', R9, R9, weight_hwio.astype(jnp.float32))
    lhs = jnp.transpose(wf, (0, 1, 5, 2, 3, 4)).reshape(4 * Cout, 9 * Cin)
    lhs = lhs.astype(jnp.bfloat16)                         # row = (2*py+px)*Cout + co
    bias4 = jnp.tile(bias.astype(jnp.float32), 4).reshape(4 * Cout, 1)

    x_flat = x_nchw.reshape(N, Cin, HW)    # free contiguous reshape; pad/cast in-kernel

    kernel = functools.partial(_fused_upconv_kernel, H=H, W=W, Cin=Cin, Cout=Cout)

    flops = 2 * N * HW * (4 * Cout) * (9 * Cin)            # actual stacked-phase MXU work
    bytes_accessed = (x_flat.size * 4 + lhs.size * 2 + bias4.size * 4
                      + N * 2 * Cout * HW * 4)             # kernel-side HBM traffic

    out_u32 = pl.pallas_call(
        kernel,
        out_shape=jax.ShapeDtypeStruct((N, 2, Cout, HW), jnp.uint32),
        grid=(N,),
        in_specs=[
            pl.BlockSpec((1, Cin, HW), lambda n: (n, 0, 0)),
            pl.BlockSpec((4 * Cout, 9 * Cin), lambda n: (0, 0)),
            pl.BlockSpec((4 * Cout, 1), lambda n: (0, 0)),
        ],
        out_specs=pl.BlockSpec((1, 2, Cout, HW), lambda n: (n, 0, 0, 0)),
        scratch_shapes=[pltpu.VMEM((Cin, Mp), jnp.bfloat16),
                        pltpu.VMEM((9 * Cin, HW), jnp.bfloat16)],
        compiler_params=pltpu.CompilerParams(
            dimension_semantics=("parallel",),
            vmem_limit_bytes=_vmem_limit_bytes()),
        cost_estimate=pl.CostEstimate(flops=int(flops), transcendentals=0,
                                      bytes_accessed=int(bytes_accessed)),
    )(x_flat, lhs, bias4)

    # ---- unpack to the final NCHW layout ----
    # u32 -> (even, odd) bf16 column pair; low 16 bits = even output column (px = 0).
    pairs = jax.lax.bitcast_convert_type(out_u32.reshape(N, 2, Cout, H, W),
                                         jnp.bfloat16)      # (N, py, Cout, H, W, px)
    # TODO(synk): this row-parity interleave + f32 cast is the one remaining wrapper
    # pass (bf16 read + f32 write); fully fusing it needs a sublane-strided output DMA.
    out = jnp.transpose(pairs, (0, 2, 3, 1, 4, 5)).reshape(N, Cout, 2 * H, 2 * W)
    return out.astype(jnp.float32)


def _reference(x_nchw, weight_hwio, bias):
    # Pure-JAX reference: upsample -> conv -> bias -> relu, all in f32 NCHW.
    x_up = jnp.repeat(jnp.repeat(x_nchw, 2, axis=2), 2, axis=3)
    w_oihw = jnp.transpose(weight_hwio, (3, 2, 0, 1))
    y = jax.lax.conv_general_dilated(
        x_up, w_oihw, window_strides=(1, 1), padding=((1, 1), (1, 1)),
        dimension_numbers=("NCHW", "OIHW", "NCHW"),
        precision=jax.lax.Precision.HIGHEST)
    y = y + bias[None, :, None, None]
    return jnp.maximum(y, 0.0)


if __name__ == "__main__":
    key = jax.random.PRNGKey(0)
    kx, kw, kb = jax.random.split(key, 3)

    N, Cin, Cout, H, W = 2, 4, 8, 16, 16      # output spatial becomes 32x32
    x = jax.random.normal(kx, (N, Cin, H, W), dtype=jnp.float32)
    # Synthetic Conv2d(in=4, out=8, k=3, padding=1) parameters (HWIO) with bias.
    weight = jax.random.normal(kw, (3, 3, Cin, Cout), dtype=jnp.float32) * 0.1
    bias = jax.random.normal(kb, (Cout,), dtype=jnp.float32) * 0.1

    fwd = jax.jit(unet_decoder_block)
    out = jax.block_until_ready(fwd(x, weight, bias))

    ref = _reference(x, weight, bias)
    assert out.shape == (N, Cout, 2 * H, 2 * W), out.shape
    # bf16 MXU operands + bf16-rounded packed output -> keep a bf16-level tolerance.
    assert jnp.allclose(out, ref, rtol=2e-2, atol=2e-2), (
        float(jnp.max(jnp.abs(out - ref))))

    print("KERNEL_OK")
</pallas_src>

<mosaic_0001>
module attributes {stable_mosaic.version = 11 : i64} {
  func.func @_fused_upconv_kernel(%arg0: i32, %arg1: memref<1x4x256xf32, #tpu.memory_space<vmem>>, %arg2: memref<32x36xbf16, #tpu.memory_space<vmem>>, %arg3: memref<32x1xf32, #tpu.memory_space<vmem>>, %arg4: memref<1x2x8x256xi32, #tpu.memory_space<vmem>>, %arg5: memref<4x290xbf16, #tpu.memory_space<vmem>>, %arg6: memref<36x256xbf16, #tpu.memory_space<vmem>>) attributes {dimension_semantics = [#tpu.dimension_semantics<parallel>], iteration_bounds = array<i64: 2>, scalar_prefetch = 0 : i64, scratch_operands = 2 : i64, tpu.core_type = #tpu.core_type<tc>, window_params = [{transform_indices = @transform_0, window_bounds = array<i64: 1, 4, 256>}, {pipeline_mode = #tpu.pipeline_mode<synchronous>, transform_indices = @transform_1, window_bounds = array<i64: 32, 36>}, {pipeline_mode = #tpu.pipeline_mode<synchronous>, transform_indices = @transform_2, window_bounds = array<i64: 32, 1>}, {transform_indices = @transform_3, window_bounds = array<i64: 1, 2, 8, 256>}]} {
    %cst = arith.constant 0.000000e+00 : bf16
    %0 = vector.broadcast %cst : bf16 to vector<4x17xbf16>
    %c0 = arith.constant 0 : index
    %c0_0 = arith.constant 0 : index
    %1 = vector.load %arg5[%c0, %c0_0] : memref<4x290xbf16, #tpu.memory_space<vmem>>, vector<4x17xbf16>
    tpu.vector_store %arg5[%c0, %c0_0], %0 {strides = array<i32>} : memref<4x290xbf16, #tpu.memory_space<vmem>>, vector<4x17xbf16>,
    %cst_1 = arith.constant 0.000000e+00 : bf16
    %2 = vector.broadcast %cst_1 : bf16 to vector<4x17xbf16>
    %c0_2 = arith.constant 0 : index
    %c273 = arith.constant 273 : index
    %3 = vector.load %arg5[%c0_2, %c273] : memref<4x290xbf16, #tpu.memory_space<vmem>>, vector<4x17xbf16>
    tpu.vector_store %arg5[%c0_2, %c273], %2 {strides = array<i32>} : memref<4x290xbf16, #tpu.memory_space<vmem>>, vector<4x17xbf16>,
    %c0_3 = arith.constant 0 : index
    %c0_4 = arith.constant 0 : index
    %c0_5 = arith.constant 0 : index
    %4 = vector.load %arg1[%c0_3, %c0_4, %c0_5] : memref<1x4x256xf32, #tpu.memory_space<vmem>>, vector<1x4x256xf32>
    %5 = vector.shape_cast %4 : vector<1x4x256xf32> to vector<4x256xf32>
    %6 = arith.truncf %5 : vector<4x256xf32> to vector<4x256xbf16>
    %c0_6 = arith.constant 0 : index
    %c17 = arith.constant 17 : index
    %7 = vector.load %arg5[%c0_6, %c17] : memref<4x290xbf16, #tpu.memory_space<vmem>>, vector<4x256xbf16>
    tpu.vector_store %arg5[%c0_6, %c17], %6 {strides = array<i32>} : memref<4x290xbf16, #tpu.memory_space<vmem>>, vector<4x256xbf16>,
    %8 = tpu.iota {dimensions = array<i32: 1>} : vector<4x256xi32>
    %c16_i32 = arith.constant 16 : i32
    %c0_i32 = arith.constant 0 : i32
    %9 = arith.cmpi eq, %c16_i32, %c0_i32 : i32
    %c1_i32 = arith.constant 1 : i32
    %10 = arith.select %9, %c1_i32, %c16_i32 : i32
    %11 = vector.broadcast %10 : i32 to vector<4x256xi32>
    %12 = arith.remsi %8, %11 : vector<4x256xi32>
    %c0_i32_7 = arith.constant 0 : i32
    %13 = vector.broadcast %c0_i32_7 : i32 to vector<4x256xi32>
    %14 = arith.cmpi ne, %12, %13 : vector<4x256xi32>
    %c0_i32_8 = arith.constant 0 : i32
    %15 = vector.broadcast %c0_i32_8 : i32 to vector<4x256xi32>
    %16 = arith.cmpi slt, %12, %15 : vector<4x256xi32>
    %c0_i32_9 = arith.constant 0 : i32
    %17 = arith.cmpi slt, %10, %c0_i32_9 : i32
    %18 = vector.broadcast %17 : i1 to vector<4x256xi1>
    %19 = vector.broadcast %18 : vector<4x256xi1> to vector<4x256xi1>
    %20 = arith.xori %16, %19 : vector<4x256xi1>
    %21 = arith.andi %20, %14 : vector<4x256xi1>
    %22 = vector.broadcast %10 : i32 to vector<4x256xi32>
    %23 = arith.addi %12, %22 : vector<4x256xi32>
    %24 = arith.select %21, %23, %12 : vector<4x256xi1>, vector<4x256xi32>
    %c0_i32_10 = arith.constant 0 : i32
    %25 = vector.broadcast %c0_i32_10 : i32 to vector<4x256xi32>
    %26 = arith.cmpi eq, %24, %25 : vector<4x256xi32>
    %cst_11 = arith.constant 0.000000e+00 : f32
    %cst_12 = arith.constant 1.000000e+00 : f32
    %27 = vector.broadcast %cst_11 : f32 to vector<4x256xf32>
    %28 = vector.broadcast %cst_12 : f32 to vector<4x256xf32>
    %29 = arith.select %26, %27, %28 : vector<4x256xi1>, vector<4x256xf32>
    %30 = arith.truncf %29 : vector<4x256xf32> to vector<4x256xbf16>
    %c15_i32 = arith.constant 15 : i32
    %31 = vector.broadcast %c15_i32 : i32 to vector<4x256xi32>
    %32 = arith.cmpi eq, %24, %31 : vector<4x256xi32>
    %cst_13 = arith.constant 0.000000e+00 : f32
    %cst_14 = arith.constant 1.000000e+00 : f32
    %33 = vector.broadcast %cst_13 : f32 to vector<4x256xf32>
    %34 = vector.broadcast %cst_14 : f32 to vector<4x256xf32>
    %35 = arith.select %32, %33, %34 : vector<4x256xi1>, vector<4x256xf32>
    %36 = arith.truncf %35 : vector<4x256xf32> to vector<4x256xbf16>
    %c0_15 = arith.constant 0 : index
    %c0_16 = arith.constant 0 : index
    %37 = vector.load %arg5[%c0_15, %c0_16] : memref<4x290xbf16, #tpu.memory_space<vmem>>, vector<4x256xbf16>
    %38 = arith.mulf %37, %30 : vector<4x256xbf16>
    %c0_17 = arith.constant 0 : index
    %c0_18 = arith.constant 0 : index
    %39 = vector.load %arg6[%c0_17, %c0_18] : memref<36x256xbf16, #tpu.memory_space<vmem>>, vector<4x256xbf16>
    tpu.vector_store %arg6[%c0_17, %c0_18], %38 {strides = array<i32>} : memref<36x256xbf16, #tpu.memory_space<vmem>>, vector<4x256xbf16>,
    %c0_19 = arith.constant 0 : index
    %c1 = arith.constant 1 : index
    %40 = vector.load %arg5[%c0_19, %c1] : memref<4x290xbf16, #tpu.memory_space<vmem>>, vector<4x256xbf16>
    %c4 = arith.constant 4 : index
    %c0_20 = arith.constant 0 : index
    %41 = vector.load %arg6[%c4, %c0_20] : memref<36x256xbf16, #tpu.memory_space<vmem>>, vector<4x256xbf16>
    tpu.vector_store %arg6[%c4, %c0_20], %40 {strides = array<i32>} : memref<36x256xbf16, #tpu.memory_space<vmem>>, vector<4x256xbf16>,
    %c0_21 = arith.constant 0 : index
    %c2 = arith.constant 2 : index
    %42 = vector.load %arg5[%c0_21, %c2] : memref<4x290xbf16, #tpu.memory_space<vmem>>, vector<4x256xbf16>
    %43 = arith.mulf %42, %36 : vector<4x256xbf16>
    %c8 = arith.constant 8 : index
    %c0_22 = arith.constant 0 : index
    %44 = vector.load %arg6[%c8, %c0_22] : memref<36x256xbf16, #tpu.memory_space<vmem>>, vector<4x256xbf16>
    tpu.vector_store %arg6[%c8, %c0_22], %43 {strides = array<i32>} : memref<36x256xbf16, #tpu.memory_space<vmem>>, vector<4x256xbf16>,
    %c0_23 = arith.constant 0 : index
    %c16 = arith.constant 16 : index
    %45 = vector.load %arg5[%c0_23, %c16] : memref<4x290xbf16, #tpu.memory_space<vmem>>, vector<4x256xbf16>
    %46 = arith.mulf %45, %30 : vector<4x256xbf16>
    %c12 = arith.constant 12 : index
    %c0_24 = arith.constant 0 : index
    %47 = vector.load %arg6[%c12, %c0_24] : memref<36x256xbf16, #tpu.memory_space<vmem>>, vector<4x256xbf16>
    tpu.vector_store %arg6[%c12, %c0_24], %46 {strides = array<i32>} : memref<36x256xbf16, #tpu.memory_space<vmem>>, vector<4x256xbf16>,
    %c0_25 = arith.constant 0 : index
    %c17_26 = arith.constant 17 : index
    %48 = vector.load %arg5[%c0_25, %c17_26] : memref<4x290xbf16, #tpu.memory_space<vmem>>, vector<4x256xbf16>
    %c16_27 = arith.constant 16 : index
    %c0_28 = arith.constant 0 : index
    %49 = vector.load %arg6[%c16_27, %c0_28] : memref<36x256xbf16, #tpu.memory_space<vmem>>, vector<4x256xbf16>
    tpu.vector_store %arg6[%c16_27, %c0_28], %48 {strides = array<i32>} : memref<36x256xbf16, #tpu.memory_space<vmem>>, vector<4x256xbf16>,
    %c0_29 = arith.constant 0 : index
    %c18 = arith.constant 18 : index
    %50 = vector.load %arg5[%c0_29, %c18] : memref<4x290xbf16, #tpu.memory_space<vmem>>, vector<4x256xbf16>
    %51 = arith.mulf %50, %36 : vector<4x256xbf16>
    %c20 = arith.constant 20 : index
    %c0_30 = arith.constant 0 : index
    %52 = vector.load %arg6[%c20, %c0_30] : memref<36x256xbf16, #tpu.memory_space<vmem>>, vector<4x256xbf16>
    tpu.vector_store %arg6[%c20, %c0_30], %51 {strides = array<i32>} : memref<36x256xbf16, #tpu.memory_space<vmem>>, vector<4x256xbf16>,
    %c0_31 = arith.constant 0 : index
    %c32 = arith.constant 32 : index
    %53 = vector.load %arg5[%c0_31, %c32] : memref<4x290xbf16, #tpu.memory_space<vmem>>, vector<4x256xbf16>
    %54 = arith.mulf %53, %30 : vector<4x256xbf16>
    %c24 = arith.constant 24 : index
    %c0_32 = arith.constant 0 : index
    %55 = vector.load %arg6[%c24, %c0_32] : memref<36x256xbf16, #tpu.memory_space<vmem>>, vector<4x256xbf16>
    tpu.vector_store %arg6[%c24, %c0_32], %54 {strides = array<i32>} : memref<36x256xbf16, #tpu.memory_space<vmem>>, vector<4x256xbf16>,
    %c0_33 = arith.constant 0 : index
    %c33 = arith.constant 33 : index
    %56 = vector.load %arg5[%c0_33, %c33] : memref<4x290xbf16, #tpu.memory_space<vmem>>, vector<4x256xbf16>
    %c28 = arith.constant 28 : index
    %c0_34 = arith.constant 0 : index
    %57 = vector.load %arg6[%c28, %c0_34] : memref<36x256xbf16, #tpu.memory_space<vmem>>, vector<4x256xbf16>
    tpu.vector_store %arg6[%c28, %c0_34], %56 {strides = array<i32>} : memref<36x256xbf16, #tpu.memory_space<vmem>>, vector<4x256xbf16>,
    %c0_35 = arith.constant 0 : index
    %c34 = arith.constant 34 : index
    %58 = vector.load %arg5[%c0_35, %c34] : memref<4x290xbf16, #tpu.memory_space<vmem>>, vector<4x256xbf16>
    %59 = arith.mulf %58, %36 : vector<4x256xbf16>
    %c32_36 = arith.constant 32 : index
    %c0_37 = arith.constant 0 : index
    %60 = vector.load %arg6[%c32_36, %c0_37] : memref<36x256xbf16, #tpu.memory_space<vmem>>, vector<4x256xbf16>
    tpu.vector_store %arg6[%c32_36, %c0_37], %59 {strides = array<i32>} : memref<36x256xbf16, #tpu.memory_space<vmem>>, vector<4x256xbf16>,
    %c0_38 = arith.constant 0 : index
    %c0_39 = arith.constant 0 : index
    %61 = vector.load %arg2[%c0_38, %c0_39] : memref<32x36xbf16, #tpu.memory_space<vmem>>, vector<32x36xbf16>
    %c0_40 = arith.constant 0 : index
    %c0_41 = arith.constant 0 : index
    %62 = vector.load %arg6[%c0_40, %c0_41] : memref<36x256xbf16, #tpu.memory_space<vmem>>, vector<36x256xbf16>
    %cst_42 = arith.constant dense<0.000000e+00> : vector<32x256xf32>
    %63 = tpu.matmul %61, %62, %cst_42 {dimension_numbers = #tpu.dot_dimension_numbers<[1], [0], [0], [1], [0, 0, 1, 1], [], []>} : vector<32x36xbf16>, vector<36x256xbf16>, vector<32x256xf32> -> vector<32x256xf32>
    %c0_43 = arith.constant 0 : index
    %c0_44 = arith.constant 0 : index
    %64 = vector.load %arg3[%c0_43, %c0_44] : memref<32x1xf32, #tpu.memory_space<vmem>>, vector<32x1xf32>
    %65 = vector.broadcast %64 : vector<32x1xf32> to vector<32x256xf32>
    %66 = arith.addf %63, %65 : vector<32x256xf32>
    %cst_45 = arith.constant 0.000000e+00 : f32
    %67 = vector.broadcast %cst_45 : f32 to vector<32x256xf32>
    %68 = arith.maximumf %66, %67 : vector<32x256xf32>
    %69 = vector.extract_strided_slice %68 {offsets = [0, 0], sizes = [8, 256], strides = [1, 1]} : vector<32x256xf32> to vector<8x256xf32>
    %70 = vector.extract_strided_slice %68 {offsets = [8, 0], sizes = [8, 256], strides = [1, 1]} : vector<32x256xf32> to vector<8x256xf32>
    %71 = tpu.bitcast %69 : vector<8x256xf32> -> vector<8x256xi32>
    %c32767_i32 = arith.constant 32767 : i32
    %72 = vector.broadcast %c32767_i32 : i32 to vector<8x256xi32>
    %73 = arith.addi %71, %72 : vector<8x256xi32>
    %c16_i32_46 = arith.constant 16 : i32
    %74 = vector.broadcast %c16_i32_46 : i32 to vector<8x256xi32>
    %75 = arith.shrui %71, %74 : vector<8x256xi32>
    %c1_i32_47 = arith.constant 1 : i32
    %76 = vector.broadcast %c1_i32_47 : i32 to vector<8x256xi32>
    %77 = arith.andi %75, %76 : vector<8x256xi32>
    %78 = arith.addi %73, %77 : vector<8x256xi32>
    %c16_i32_48 = arith.constant 16 : i32
    %79 = vector.broadcast %c16_i32_48 : i32 to vector<8x256xi32>
    %80 = arith.shrui %78, %79 : vector<8x256xi32>
    %81 = tpu.bitcast %70 : vector<8x256xf32> -> vector<8x256xi32>
    %c32767_i32_49 = arith.constant 32767 : i32
    %82 = vector.broadcast %c32767_i32_49 : i32 to vector<8x256xi32>
    %83 = arith.addi %81, %82 : vector<8x256xi32>
    %c16_i32_50 = arith.constant 16 : i32
    %84 = vector.broadcast %c16_i32_50 : i32 to vector<8x256xi32>
    %85 = arith.shrui %81, %84 : vector<8x256xi32>
    %c1_i32_51 = arith.constant 1 : i32
    %86 = vector.broadcast %c1_i32_51 : i32 to vector<8x256xi32>
    %87 = arith.andi %85, %86 : vector<8x256xi32>
    %88 = arith.addi %83, %87 : vector<8x256xi32>
    %c16_i32_52 = arith.constant 16 : i32
    %89 = vector.broadcast %c16_i32_52 : i32 to vector<8x256xi32>
    %90 = arith.shrui %88, %89 : vector<8x256xi32>
    %c16_i32_53 = arith.constant 16 : i32
    %91 = vector.broadcast %c16_i32_53 : i32 to vector<8x256xi32>
    %92 = arith.shli %90, %91 : vector<8x256xi32>
    %93 = arith.ori %80, %92 : vector<8x256xi32>
    %c0_54 = arith.constant 0 : index
    %c0_55 = arith.constant 0 : index
    %c0_56 = arith.constant 0 : index
    %c0_57 = arith.constant 0 : index
    %94 = vector.load %arg4[%c0_54, %c0_55, %c0_56, %c0_57] : memref<1x2x8x256xi32, #tpu.memory_space<vmem>>, vector<1x1x8x256xi32>
    %95 = vector.shape_cast %94 : vector<1x1x8x256xi32> to vector<8x256xi32>
    %96 = vector.shape_cast %93 : vector<8x256xi32> to vector<1x1x8x256xi32>
    tpu.vector_store %arg4[%c0_54, %c0_55, %c0_56, %c0_57], %96 {strides = array<i32>} : memref<1x2x8x256xi32, #tpu.memory_space<vmem>>, vector<1x1x8x256xi32>,
    %97 = vector.extract_strided_slice %68 {offsets = [16, 0], sizes = [8, 256], strides = [1, 1]} : vector<32x256xf32> to vector<8x256xf32>
    %98 = vector.extract_strided_slice %68 {offsets = [24, 0], sizes = [8, 256], strides = [1, 1]} : vector<32x256xf32> to vector<8x256xf32>
    %99 = tpu.bitcast %97 : vector<8x256xf32> -> vector<8x256xi32>
    %c32767_i32_58 = arith.constant 32767 : i32
    %100 = vector.broadcast %c32767_i32_58 : i32 to vector<8x256xi32>
    %101 = arith.addi %99, %100 : vector<8x256xi32>
    %c16_i32_59 = arith.constant 16 : i32
    %102 = vector.broadcast %c16_i32_59 : i32 to vector<8x256xi32>
    %103 = arith.shrui %99, %102 : vector<8x256xi32>
    %c1_i32_60 = arith.constant 1 : i32
    %104 = vector.broadcast %c1_i32_60 : i32 to vector<8x256xi32>
    %105 = arith.andi %103, %104 : vector<8x256xi32>
    %106 = arith.addi %101, %105 : vector<8x256xi32>
    %c16_i32_61 = arith.constant 16 : i32
    %107 = vector.broadcast %c16_i32_61 : i32 to vector<8x256xi32>
    %108 = arith.shrui %106, %107 : vector<8x256xi32>
    %109 = tpu.bitcast %98 : vector<8x256xf32> -> vector<8x256xi32>
    %c32767_i32_62 = arith.constant 32767 : i32
    %110 = vector.broadcast %c32767_i32_62 : i32 to vector<8x256xi32>
    %111 = arith.addi %109, %110 : vector<8x256xi32>
    %c16_i32_63 = arith.constant 16 : i32
    %112 = vector.broadcast %c16_i32_63 : i32 to vector<8x256xi32>
    %113 = arith.shrui %109, %112 : vector<8x256xi32>
    %c1_i32_64 = arith.constant 1 : i32
    %114 = vector.broadcast %c1_i32_64 : i32 to vector<8x256xi32>
    %115 = arith.andi %113, %114 : vector<8x256xi32>
    %116 = arith.addi %111, %115 : vector<8x256xi32>
    %c16_i32_65 = arith.constant 16 : i32
    %117 = vector.broadcast %c16_i32_65 : i32 to vector<8x256xi32>
    %118 = arith.shrui %116, %117 : vector<8x256xi32>
    %c16_i32_66 = arith.constant 16 : i32
    %119 = vector.broadcast %c16_i32_66 : i32 to vector<8x256xi32>
    %120 = arith.shli %118, %119 : vector<8x256xi32>
    %121 = arith.ori %108, %120 : vector<8x256xi32>
    %c0_67 = arith.constant 0 : index
    %c1_68 = arith.constant 1 : index
    %c0_69 = arith.constant 0 : index
    %c0_70 = arith.constant 0 : index
    %122 = vector.load %arg4[%c0_67, %c1_68, %c0_69, %c0_70] : memref<1x2x8x256xi32, #tpu.memory_space<vmem>>, vector<1x1x8x256xi32>
    %123 = vector.shape_cast %122 : vector<1x1x8x256xi32> to vector<8x256xi32>
    %124 = vector.shape_cast %121 : vector<8x256xi32> to vector<1x1x8x256xi32>
    tpu.vector_store %arg4[%c0_67, %c1_68, %c0_69, %c0_70], %124 {strides = array<i32>} : memref<1x2x8x256xi32, #tpu.memory_space<vmem>>, vector<1x1x8x256xi32>,
    return
  }
  func.func @transform_0(%arg0: i32) -> (i32, i32, i32) {
    %c0_i32 = arith.constant 0 : i32
    %c0_i32_0 = arith.constant 0 : i32
    %c0_i32_1 = arith.constant 0 : i32
    return %arg0, %c0_i32, %c0_i32_0 : i32, i32, i32
  }
  func.func @transform_1(%arg0: i32) -> (i32, i32) {
    %c0_i32 = arith.constant 0 : i32
    %c0_i32_0 = arith.constant 0 : i32
    %c0_i32_1 = arith.constant 0 : i32
    return %c0_i32, %c0_i32_0 : i32, i32
  }
  func.func @transform_2(%arg0: i32) -> (i32, i32) {
    %c0_i32 = arith.constant 0 : i32
    %c0_i32_0 = arith.constant 0 : i32
    %c0_i32_1 = arith.constant 0 : i32
    return %c0_i32, %c0_i32_0 : i32, i32
  }
  func.func @transform_3(%arg0: i32) -> (i32, i32, i32, i32) {
    %c0_i32 = arith.constant 0 : i32
    %c0_i32_0 = arith.constant 0 : i32
    %c0_i32_1 = arith.constant 0 : i32
    %c0_i32_2 = arith.constant 0 : i32
    return %arg0, %c0_i32, %c0_i32_0, %c0_i32_1 : i32, i32, i32, i32
  }
}

</mosaic_0001>

<bundles_post_ra>
// kernel: tile.0
= control target key start
LH: loop header
LB: loop body
LE: loop exit
PB: predicated region body
PF: predicated region fallthrough
CT: control target
= control target key end

     0   :  { %s66_s8 = smov 125   ;;  %vm7_vm0 = vcmask 7168   ;;  %s67_s11 = smov 126   ;;  %s117_s0 = inlined_call_operand.vmem [shape: f32[4,8], index: 0, kind: input, shape index: {}]   ;;  %s118_s1 = inlined_call_operand.vmem [shape: f32[32,1], index: 1, kind: output, shape index: {}]  }
   0x1   :  { %v4_v0 = vld [vmem:[%s117_s0] sm:$0xf]  ;;  %s65_s0 = smov 127   ;;  %s68_s12 = smov 124  }
   0x2   :  { %5 = vst [vmem:[#allocation0] sm:$0xf] %v4_v0  ;;  %s69_s13 = smov 123   ;;  %s70_s14 = smov 122  }
   0x3   :  { %s71_s15 = smov 121  }
   0x9   :  { %v9_v1 = vld [vmem:[#allocation0] sm:$0xf]  }
   0xa   :  { %v21_v2 = vld [vmem:[#allocation0] sm:$0xf]   ;;  %10 = vrot.lane.b32.xlu0 %v9_v1, %s65_s0 }
   0xb   :  { %22 = vrot.lane.b32.xlu1 %v21_v2, %s66_s8  ;;  %v15_v3 = vld [vmem:[#allocation0] sm:$0xf]  }
   0xc   :  { %v27_v4 = vld [vmem:[#allocation0] sm:$0xf]  }
   0xd   :  { %v6_v5 = vld [vmem:[#allocation0] sm:$0xf]  }
   0xe   :  { %8 = vst.msk [vmem:[%s118_s1] ss:$8 sm:$0xf] %vm7_vm0, %v6_v5   ;;  %16 = vrot.lane.b32.xlu0 %v15_v3, %s67_s11  ;;  %v33_v6 = vld [vmem:[#allocation0] sm:$0xf]  }
   0xf   :  { %28 = vrot.lane.b32.xlu1 %v27_v4, %s68_s12  ;;  %v39_v7 = vld [vmem:[#allocation0] sm:$0xf]  }
  0x10   :  { %v45_v8 = vld [vmem:[#allocation0] sm:$0xf]  }
  0x12   :  { %34 = vrot.lane.b32.xlu0 %v33_v6, %s69_s13 }
  0x13   :  { %40 = vrot.lane.b32.xlu1 %v39_v7, %s70_s14 }
  0x16   :  { %46 = vrot.lane.b32.xlu0 %v45_v8, %s71_s15 }
  0x7c   :  { %v11_v9 = vpop.permute.xlu0 %10  }
  0x7d   :  { %v23_v10 = vpop.permute.xlu1 %22   ;;  %51 = vst.msk [vmem:[%s118_s1 + $0x1] ss:$8 sm:$0xf] %vm7_vm0, %v11_v9  }
  0x7e   :  { %53 = vst.msk [vmem:[%s118_s1 + $0x3] ss:$8 sm:$0xf] %vm7_vm0, %v23_v10  }
  0x80   :  { %v17_v11 = vpop.permute.xlu0 %16  }
  0x81   :  { %v29_v12 = vpop.permute.xlu1 %28   ;;  %52 = vst.msk [vmem:[%s118_s1 + $0x2] ss:$8 sm:$0xf] %vm7_vm0, %v17_v11  }
  0x82   :  { %54 = vst.msk [vmem:[%s118_s1 + $0x4] ss:$8 sm:$0xf] %vm7_vm0, %v29_v12  }
  0x84   :  { %v35_v13 = vpop.permute.xlu0 %34  }
  0x85   :  { %v41_v14 = vpop.permute.xlu1 %40   ;;  %55 = vst.msk [vmem:[%s118_s1 + $0x5] ss:$8 sm:$0xf] %vm7_vm0, %v35_v13  }
  0x86   :  { %56 = vst.msk [vmem:[%s118_s1 + $0x6] ss:$8 sm:$0xf] %vm7_vm0, %v41_v14  }
  0x88   :  { %v47_v15 = vpop.permute.xlu0 %46  }
  0x89   :  { %57 = vst.msk [vmem:[%s118_s1 + $0x7] ss:$8 sm:$0xf] %vm7_vm0, %v47_v15  }

// kernel: tile.8
= control target key start
LH: loop header
LB: loop body
LE: loop exit
PB: predicated region body
PF: predicated region fallthrough
CT: control target
= control target key end

     0   :  { %s22_s0 = inlined_call_operand.vmem [shape: f32[8], index: 0, kind: input, shape index: {}]   ;;  %s23_s1 = inlined_call_operand.vmem [shape: f32[4,8], index: 1, kind: output, shape index: {}]  }
   0x1   :  { %v4_v0 = vld [vmem:[%s22_s0] ss:$0 sm:$0xff] }
   0x2   :  { %5 = vst [vmem:[%s23_s1] sm:$0xf] %v4_v0 }

// kernel: unet_decoder_block.1
= control target key start
LH: loop header
LB: loop body
LE: loop exit
PB: predicated region body
PF: predicated region fallthrough
CT: control target
= control target key end

     0   :  { %s917_s12 = smov 0   ;;  %s992_s0 = inlined_call_operand.vmem [shape: f32[2,4,256], index: 0, kind: input, shape index: {}]   ;;  %s993_s1 = inlined_call_operand.vmem [shape: bf16[32,36], index: 1, kind: input, shape index: {}]   ;;  %s994_s2 = inlined_call_operand.vmem [shape: f32[32,1], index: 2, kind: input, shape index: {}]   ;;  %s995_s3 = inlined_call_operand.vmem [shape: u32[2,2,8,256], index: 3, kind: output, shape index: {}]  }
   0x1 LB: > { %s795_s13 = sadd.s32 4294967295, %s878_s12   ;;  %p799_p0 = scmp.ge.s32.totalorder %s878_s12, 1  ;;  %s878_s12 = sphi %s917_s12, %s13_s12  }
   0x2   : > { %p137_p1 = scmp.lt.s32.totalorder %s878_s12, 3 }
   0x4   : > { %p138_p2 = pnand %p799_p0, %p137_p1 }
   0x5   : > { %p161_p3 = scmp.lt.s32.totalorder (!%p138_p2), %s795_s13, 1  ;;  %v188_v0 = vlaneseq (!%p138_p2)  ;;  %vm172_vm0 = vcmask (!%p138_p2), 132096   ;;  %v880_v1 = vmov (!%p138_p2), 1983009808   ;;  %vm174_vm1 = vcmask (!%p138_p2), 271496   ;;  %s883_s18 = smov (!%p138_p2), 17  }
   0x6   : > { %141 = sbr.rel (%p138_p2) target bundleno = 547 (0x223), region = 32  ;;  %v186_v2 = vunpack.c.l.s4 (!%p138_p2), %v880_v1  ;;  %v881_v4 = vmov (!%p138_p2), 0   ;;  %v882_v13 = vmov (!%p138_p2), 1.0   ;;  %s884_s19 = smov (!%p138_p2), 16   ;;  %vm198_vm6 = vcmask (!%p138_p2), 1041544  }
   0x7   : > { %v205_v3 = vand.u32 (!%p138_p2), 127, %v188_v0  ;;  %173 = vst.msk [vmem:[#allocation2] sm:$0x3] (!%p138_p2), %vm172_vm0, %v881_v4  ;;  %650 = vmatprep.mubr.bf16.mxu0 (!%p138_p2), %v881_v4  ;;  %660 = vmatprep.mubr.bf16.mxu1 (!%p138_p2), %v881_v4  ;;  %v189_v6 = vshrl.u32 (!%p138_p2), %v188_v0, 7  ;;  %s885_s20 = smov (!%p138_p2), 2   ;;  %s886_s21 = smov (!%p138_p2), 18  }
   0x8   : > { %175 = vst.msk [vmem:[#allocation2 + $0x4] sm:$0x3] (!%p138_p2), %vm174_vm1, %v881_v4  ;;  %v187_v5 = vunpack.c.0.s8 (!%p138_p2), %v186_v2  ;;  %857 = vset.pattern.permute.xlu1 (!%p138_p2), %v881_v4  ;;  %856 = vset.pattern.permute.xlu0 (!%p138_p2), %v881_v4  ;;  %s887_s22 = smov (!%p138_p2), 32   ;;  %s888_s23 = smov (!%p138_p2), 34   ;;  %vm199_vm7 = vcmask (!%p138_p2), 1043458   ;;  %vm201_vm9 = vcmask (!%p138_p2), 136196  }
   0x9   : > { %v206_v7 = vadd.s32 (!%p138_p2), 128, %v205_v3  ;;  %v211_v8 = vand.u32 (!%p138_p2), 15, %v205_v3  ;;  %vm200_vm8 = vmor (!%p138_p2), %vm199_vm7, %vm198_vm6  ;;  %vm195_vm10 = vcmask (!%p138_p2), 138240   ;;  %vm309_vm12 = vcmask (!%p138_p2), 15360   ;;  %s889_s24 = smov (!%p138_p2), 111   ;;  %s890_s25 = smov (!%p138_p2), 127  }
   0xa   : > { %v931_v12 = vsub.s32 (!%p138_p2), %v187_v5, %v189_v6  ;;  %vm202_vm11 = vmor (!%p138_p2), %vm201_vm9, %vm200_vm8  ;;  %vm344_vm13 = vcmask (!%p138_p2), 130048   ;;  %vm442_vm14 = vcmask (!%p138_p2), 261120   ;;  %vm407_vm15 = vcmask (!%p138_p2), 146432   ;;  %s891_s26 = smov (!%p138_p2), 95   ;;  %s892_s27 = smov (!%p138_p2), 126  }
   0xb   : > { %v218_v10 = vand.u32 (!%p138_p2), 15, %v206_v7  ;;  %vm231_vm2 = vcmp.eq.s32.totalorder (!%p138_p2), %v211_v8, 0  ;;  %vm237_vm3 = vcmp.eq.s32.totalorder (!%p138_p2), %v211_v8, 15  ;;  %s893_s28 = smov (!%p138_p2), 112   ;;  %s894_s29 = smov (!%p138_p2), 96   ;;  %vm505_vm0 = vcmask (!%p138_p2), 277504  }
   0xc   : > { %v233_v14 = vsel (!%p138_p2), %vm231_vm2, 0.0, %v882_v13  ;;  %v239_v15 = vsel (!%p138_p2), %vm237_vm3, 0.0, %v882_v13  ;;  %s895_s30 = smov (!%p138_p2), 110   ;;  %s896_s4 = smov (!%p138_p2), 94   ;;  %vm289_vm1 = vcmask (!%p138_p2), 1043456   ;;  %vm291_vm2 = vcmask (!%p138_p2), 1039360  }
   0xd   : > { %s997_s13 = smov (!%p161_p3, %s795_s13), 1  ;;  %vm232_vm4 = vcmp.eq.s32.totalorder %v218_v10, 0  ;;  %vm238_vm5 = vcmp.eq.s32.totalorder %v218_v10, 15  ;;  %vm399_vm3 = vcmask 908288   ;;  %vm336_vm6 = vcmask 1031168  }
   0xe   : > { %s823_s14 = sshll.u32 %s997_s13, 3  ;;  %v234_v17 = vsel %vm232_vm4, 0.0, %v882_v13  ;;  %v240_v18 = vsel %vm238_vm5, 0.0, %v882_v13  ;;  %vm497_vm4 = vcmask 777216   ;;  %vm371_vm5 = vcmask 916480  }
   0xf   : > { %s165_s17 = scalar_lea.vmem %s992_s0, %s823_s14  ;;  %v805_v19 = vpack.c.bf16 %v234_v17, %v233_v14  ;;  %v807_v20 = vpack.c.bf16 %v240_v18, %v239_v15  ;;  %v546_v18 = vld [vmem:[%s994_s2 + $0x8] sm:$0xff]  ;;  %vm434_vm7 = vcmask 900096   ;;  %vm469_vm8 = vcmask 785408  }
  0x10   : > { %v176_v9 = vld [vmem:[%s165_s17] sm:$0xff]  ;;  %vm532_vm9 = vcmask 769024  }
  0x11   : > { %v178_v11 = vcombine.high %v176_v9, %v176_v9  ;;  %v935_v22 = vrot.slane %v805_v19, %v931_v12  ;;  %v305_v23 = vrot.slane %v807_v20, %v931_v12  ;;  %v548_v19 = vld [vmem:[%s994_s2 + $0x18] sm:$0xff]  ;;  %v547_v20 = vld [vmem:[%s994_s2 + $0x10] sm:$0xff] }
  0x13   : > { %v804_v16 = vpack.c.bf16 %v178_v11, %v176_v9  ;;  %341 = vrot.lane.b32.xlu1 %v935_v22, %s884_s19  ;;  %s824_s19 = sshll.u32 %s997_s13, 5 }
  0x15   : > { %v191_v21 = vrot.slane %v804_v16, %v931_v12 }
  0x17   : > { %192 = vrot.lane.b32.xlu0 %v191_v21, %s883_s18  ;;  %404 = vrot.lane.b32.xlu1 %v305_v23, %s886_s21 }
  0x1b   : > { %306 = vrot.lane.b32.xlu0 %v305_v23, %s885_s20  ;;  %502 = vrot.lane.b32.xlu1 %v305_v23, %s888_s23 }
  0x1f   : > { %439 = vrot.lane.b32.xlu0 %v935_v22, %s887_s22  ;;  %s170_s22 = scalar_lea.vmem %s995_s3, %s824_s19 }
  0x85   : > { %v342_v28 = vpop.permute.xlu1 %341 }
  0x86   : > { %v343_v30 = vrot.slane %v342_v28, 6 }
  0x88   : > { %v345_v40 = vsel %vm344_vm13, %v343_v30, %v342_v28 }
  0x89   : > { %v193_v24 = vpop.permute.xlu0 %192  ;;  %v405_v47 = vpop.permute.xlu1 %404 }
  0x8a   : > { %v194_v25 = vrot.slane %v193_v24, 6  ;;  %v406_v51 = vrot.slane %v405_v47, 6 }
  0x8c   : > { %v196_v26 = vsel %vm195_vm10, %v194_v25, %v193_v24  ;;  %v408_v58 = vsel %vm407_vm15, %v406_v51, %v405_v47  ;;  %vm611_vm10 = vcmask 1041408  }
  0x8d   : > { %203 = vst.msk [vmem:[#allocation2] sm:$0x3f] %vm202_vm11, %v196_v26  ;;  %v307_v27 = vpop.permute.xlu0 %306  ;;  %v503_v59 = vpop.permute.xlu1 %502  ;;  %vm604_vm11 = vcmask 293888  }
  0x8e   : > { %v308_v29 = vrot.slane %v307_v27, 6  ;;  %v504_v0 = vrot.slane %v503_v59, 6 }
  0x90   : > { %v310_v36 = vsel %vm309_vm12, %v308_v29, %v307_v27  ;;  %v506_v6 = vsel %vm505_vm0, %v504_v0, %v503_v59 }
  0x91   : > { %v440_v31 = vpop.permute.xlu0 %439 }
  0x92   : > { %v441_v37 = vrot.slane %v440_v31, 6 }
  0x94   : > { %v375_v32 = vld [vmem:[#allocation2] sm:$0x3f]  ;;  %v443_v49 = vsel %vm442_vm14, %v441_v37, %v440_v31 }
  0x95   : > { %v384_v33 = vrot.slane %v375_v32, %v931_v12  ;;  %v266_v34 = vld [vmem:[#allocation2] sm:$0x3f]  ;;  %v377_v56 = vcombine.high %v375_v32, %v375_v32 }
  0x96   : > { %v295_v35 = vld [vmem:[#allocation2] sm:$0x3f]  ;;  %v282_v38 = vrot.slane %v266_v34, %v931_v12  ;;  %v268_v42 = vcombine.low %v266_v34, %v266_v34 }
  0x97   : > { %v340_v39 = vld [vmem:[#allocation2] sm:$0x3f]  ;;  %392 = vrot.lane.b32.xlu0 %v384_v33, %s889_s24  ;;  %v312_v43 = vmul.bf16 %v310_v36, %v295_v35  ;;  %v391_v63 = vrot.slane %v377_v56, %v931_v12 }
  0x98   : > { %v473_v41 = vld [vmem:[#allocation2] sm:$0x3f]  ;;  %285 = vrot.lane.b32.xlu1 %v282_v38, %s890_s25  ;;  %v275_v44 = vrot.slane %v268_v42, %v931_v12  ;;  %v347_v46 = vmul.bf16 %v345_v40, %v340_v39 }
  0x99   : > { %v243_v45 = vld [vmem:[#allocation2] sm:$0xf]  ;;  %v489_v50 = vrot.slane %v473_v41, %v931_v12  ;;  %v321_v54 = vrot.slane %v312_v43, %v931_v12  ;;  %v475_v61 = vcombine.low %v473_v41, %v473_v41  ;;  %v314_v3 = vcombine.high %v312_v43, %v312_v43 }
  0x9a   : > { %v438_v48 = vld [vmem:[#allocation2] sm:$0x3f]  ;;  %v255_v52 = vmul.bf16 %v935_v22, %v243_v45  ;;  %v363_v55 = vrot.slane %v347_v46, %v931_v12  ;;  %v349_v1 = vcombine.low %v347_v46, %v347_v46 }
  0x9b   : > { %283 = vrot.lane.b32.xlu0 %v275_v44, %s890_s25  ;;  %v445_v53 = vmul.bf16 %v443_v49, %v438_v48  ;;  %v403_v57 = vld [vmem:[#allocation2] sm:$0x3f]  ;;  %v482_v2 = vrot.slane %v475_v61, %v931_v12  ;;  %v328_v11 = vrot.slane %v314_v3, %v931_v12 }
  0x9c   : > { %492 = vrot.lane.b32.xlu1 %v489_v50, %s891_s26  ;;  %806 = vst.sshfl [vmem:[#allocation3] sm:$0xf pattern:$0x76325410] %v255_v52  ;;  %v410_v62 = vmul.bf16 %v408_v58, %v403_v57  ;;  %v501_v5 = vld [vmem:[#allocation2] sm:$0x3f]  ;;  %v356_v8 = vrot.slane %v349_v1, %v931_v12 }
  0x9d   : > { %v454_v60 = vrot.slane %v445_v53, %v931_v12  ;;  %v447_v9 = vcombine.high %v445_v53, %v445_v53  ;;  %v508_v10 = vmul.bf16 %v506_v6, %v501_v5 }
  0x9e   : > { %v426_v4 = vrot.slane %v410_v62, %v931_v12  ;;  %v412_v7 = vcombine.low %v410_v62, %v410_v62 }
  0x9f   : > { %329 = vrot.lane.b32.xlu0 %v321_v54, %s892_s27  ;;  %v510_v14 = vcombine.high %v508_v10, %v508_v10  ;;  %v461_v15 = vrot.slane %v447_v9, %v931_v12  ;;  %v517_v16 = vrot.slane %v508_v10, %v931_v12 }
  0xa0   : > { %366 = vrot.lane.b32.xlu1 %v363_v55, %s893_s28  ;;  %v419_v13 = vrot.slane %v412_v7, %v931_v12 }
  0xa1   : > { %v524_v17 = vrot.slane %v510_v14, %v931_v12  ;;  %v545_v12 = vld [vmem:[%s994_s2] sm:$0xff] }
  0xa2   : > { %v870_v14 = vld [vmem:[%s993_s1] sm:$0xff]  }
  0xa3   : > { %462 = vrot.lane.b32.xlu0 %v454_v60, %s894_s29 }
  0xa4   : > { %394 = vrot.lane.b32.xlu1 %v391_v63, %s889_s24 }
  0xa7   : > { %490 = vrot.lane.b32.xlu0 %v482_v2, %s891_s26 }
  0xa8   : > { %429 = vrot.lane.b32.xlu1 %v426_v4, %s895_s30 }
  0xab   : > { %364 = vrot.lane.b32.xlu0 %v356_v8, %s893_s28 }
  0xac   : > { %331 = vrot.lane.b32.xlu1 %v328_v11, %s892_s27 }
  0xaf   : > { %427 = vrot.lane.b32.xlu0 %v419_v13, %s895_s30 }
  0xb0   : > { %464 = vrot.lane.b32.xlu1 %v461_v15, %s894_s29  ;;  %v871_v15 = vld [vmem:[%s993_s1 + $0x8] sm:$0xff]  }
  0xb3   : > { %525 = vrot.lane.b32.xlu0 %v517_v16, %s896_s4 }
  0xb4   : > { %527 = vrot.lane.b32.xlu1 %v524_v17, %s896_s4 }
  0xb7   : > { %556 = vperm.xlu0 %856, %v546_v18  }
  0xb8   : > { %566 = vperm.xlu1 %857, %v548_v19  }
  0xbb   : > { %561 = vperm.xlu0 %856, %v547_v20  }
  0xbc   : > { %551 = vperm.xlu1 %857, %v545_v12  }
 0x109   : > { %v393_v21 = vpop.permute.xlu0 %392 }
 0x10a   : > { %v286_v22 = vpop.permute.xlu1 %285  ;;  %v396_v33 = vrot.slane %v393_v21, 4 }
 0x10b   : > { %v288_v24 = vrot.slane %v286_v22, 4 }
 0x10d   : > { %v284_v23 = vpop.permute.xlu0 %283 }
 0x10e   : > { %v493_v25 = vpop.permute.xlu1 %492  ;;  %v287_v26 = vrot.slane %v284_v23, 4 }
 0x10f   : > { %v495_v37 = vrot.slane %v493_v25, 4 }
 0x110   : > { %v290_v27 = vsel %vm289_vm1, %v287_v26, %v288_v24 }
 0x111   : > { %v292_v28 = vsel %vm291_vm2, %v284_v23, %v290_v27  ;;  %v330_v29 = vpop.permute.xlu0 %329 }
 0x112   : > { %294 = vst [vmem:[#allocation3] sm:$0xcc] %v292_v28  ;;  %v367_v30 = vpop.permute.xlu1 %366  ;;  %v333_v47 = vrot.slane %v330_v29, 4 }
 0x113   : > { %v369_v44 = vrot.slane %v367_v30, 4 }
 0x115   : > { %v463_v31 = vpop.permute.xlu0 %462 }
 0x116   : > { %v395_v32 = vpop.permute.xlu1 %394  ;;  %v466_v57 = vrot.slane %v463_v31, 4 }
 0x117   : > { %v397_v34 = vrot.slane %v395_v32, 4 }
 0x119   : > { %v398_v35 = vsel %vm289_vm1, %v396_v33, %v397_v34  ;;  %v491_v36 = vpop.permute.xlu0 %490 }
 0x11a   : > { %v400_v38 = vsel %vm399_vm3, %v393_v21, %v398_v35  ;;  %v430_v39 = vpop.permute.xlu1 %429  ;;  %v494_v40 = vrot.slane %v491_v36, 4 }
 0x11b   : > { %402 = vst [vmem:[#allocation3 + $0x10] sm:$0x33] %v400_v38  ;;  %v432_v53 = vrot.slane %v430_v39, 4 }
 0x11c   : > { %v496_v41 = vsel %vm289_vm1, %v494_v40, %v495_v37 }
 0x11d   : > { %v498_v42 = vsel %vm497_vm4, %v491_v36, %v496_v41  ;;  %v365_v43 = vpop.permute.xlu0 %364 }
 0x11e   : > { %500 = vst [vmem:[#allocation3 + $0x18] sm:$0xcc] %v498_v42  ;;  %v332_v45 = vpop.permute.xlu1 %331  ;;  %v368_v46 = vrot.slane %v365_v43, 4 }
 0x11f   : > { %v334_v48 = vrot.slane %v332_v45, 4 }
 0x120   : > { %v370_v49 = vsel %vm289_vm1, %v368_v46, %v369_v44 }
 0x121   : > { %v335_v50 = vsel %vm289_vm1, %v333_v47, %v334_v48  ;;  %v372_v51 = vsel %vm371_vm5, %v365_v43, %v370_v49  ;;  %v428_v52 = vpop.permute.xlu0 %427 }
 0x122   : > { %v337_v54 = vsel %vm336_vm6, %v330_v29, %v335_v50  ;;  %374 = vst [vmem:[#allocation3 + $0x8] sm:$0xcc] %v372_v51  ;;  %v465_v55 = vpop.permute.xlu1 %464  ;;  %v431_v56 = vrot.slane %v428_v52, 4 }
 0x123   : > { %339 = vst [vmem:[#allocation3 + $0x8] sm:$0x33] %v337_v54  ;;  %v467_v58 = vrot.slane %v465_v55, 4 }
 0x124   : > { %v433_v59 = vsel %vm289_vm1, %v431_v56, %v432_v53 }
 0x125   : > { %v468_v60 = vsel %vm289_vm1, %v466_v57, %v467_v58  ;;  %v435_v61 = vsel %vm434_vm7, %v428_v52, %v433_v59  ;;  %v526_v62 = vpop.permute.xlu0 %525 }
 0x126   : > { %v470_v63 = vsel %vm469_vm8, %v463_v31, %v468_v60  ;;  %437 = vst [vmem:[#allocation3 + $0x10] sm:$0xcc] %v435_v61  ;;  %v528_v0 = vpop.permute.xlu1 %527  ;;  %v529_v1 = vrot.slane %v526_v62, 4 }
 0x127   : > { %472 = vst [vmem:[#allocation3 + $0x18] sm:$0x33] %v470_v63  ;;  %v530_v2 = vrot.slane %v528_v0, 4 }
 0x129   : > { %v531_v3 = vsel %vm289_vm1, %v529_v1, %v530_v2 }
 0x12a   : > { %v533_v4 = vsel %vm532_vm9, %v526_v62, %v531_v3  ;;  %v862_v5 = vld [vmem:[#allocation3 + $0x4] ss:$8 sps:$4 sm:$0xff]   ;;  %v864_v6 = vld [vmem:[#allocation3] ss:$8 sps:$4 sm:$0xff]  }
 0x12b   : > { %535 = vst [vmem:[#allocation3 + $0x20] sm:$0x33] %v533_v4  ;;  %618 = vmatprep.subr.bf16.mxu0 %v862_v5  ;;  %825 = vmatprep.subr.bf16.mxu1 %v862_v5 }
 0x12c   : > { %619 = vmatpush1.bf16.msra.mxu0 %v864_v6  ;;  %828 = vmatpush1.bf16.msra.mxu1 %v864_v6 }
 0x12e   : > { %v865_v7 = vld [vmem:[#allocation3 + $0x14] ss:$8 sps:$4 sm:$0xff]   ;;  %v867_v8 = vld [vmem:[#allocation3 + $0x10] ss:$8 sps:$4 sm:$0xff]  }
 0x12f   : > { %620 = vmatprep.subr.bf16.mxu0 %v865_v7  ;;  %826 = vmatprep.subr.bf16.mxu1 %v865_v7 }
 0x130   : > { %621 = vmatpush1.bf16.msra.mxu0 %v867_v8  ;;  %829 = vmatpush1.bf16.msra.mxu1 %v867_v8 }
 0x132   : > { %v544_v9 = vld [vmem:[#allocation3 + $0x20] sm:$0x33] }
 0x133   : > { %v815_v10 = vcombine.high %v544_v9, %v544_v9  ;;  %v814_v11 = vcombine.low %v544_v9, %v544_v9 }
 0x135   : > { %816 = vmatprep.subr.msk.bf16.mxu0 %vm611_vm10, %v815_v10  ;;  %827 = vmatprep.subr.msk.bf16.mxu1 %vm611_vm10, %v815_v10  ;;  %v613_v13 = vsel %vm611_vm10, %v814_v11, 0 }
 0x136   : > { %623 = vmatpush1.bf16.msra.mxu0 %v613_v13  ;;  %830 = vmatpush1.bf16.msra.mxu1 %v613_v13  ;;  %v557_v17 = vpop.permute.xlu0 %556 }
 0x137   : > { %v567_v16 = vpop.permute.xlu1 %566 }
 0x139   : > { %817 = vmatmul.mubr.msk.bf16.vlgmr.msra.gmra.mrb[0].mxu0 %vm604_vm11, %v870_v14  ;;  %818 = vmatmul.mubr.msk.bf16.vlgmr.msra.gmra.mrb[0].mxu1 %vm604_vm11, %v871_v15 }
 0x13a   : > { %v562_v19 = vpop.permute.xlu0 %561 }
 0x13b   : > { %v552_v18 = vpop.permute.xlu1 %551 }
 0x20c   : > { %v652_v20 = vpop.f32.mrb[0].mxu0  ;;  %v662_v12 = vpop.f32.mrb[0].mxu1 }
 0x20d   : > { %v653_v21 = vadd.f32 %v652_v20, %v552_v18  ;;  %v663_v22 = vadd.f32 %v662_v12, %v562_v19  ;;  %v654_v23 = vpop.f32.mrb[1].mxu0  ;;  %v664_v24 = vpop.f32.mrb[1].mxu1 }
 0x20e   : > { %v655_v25 = vadd.f32 %v654_v23, %v552_v18  ;;  %v665_v26 = vadd.f32 %v664_v24, %v562_v19  ;;  %v656_v27 = vpop.f32.mrb[2].mxu0  ;;  %v666_v28 = vpop.f32.mrb[2].mxu1 }
 0x20f   : > { %v671_v29 = vmax.f32 %v653_v21, 0.0  ;;  %v675_v30 = vmax.f32 %v663_v22, 0.0  ;;  %v657_v31 = vadd.f32 %v656_v27, %v557_v17  ;;  %v667_v32 = vadd.f32 %v666_v28, %v567_v16  ;;  %v658_v33 = vpop.f32.mrb[3].mxu0  ;;  %v668_v34 = vpop.f32.mrb[3].mxu1 }
 0x210   : > { %v672_v35 = vmax.f32 %v655_v25, 0.0  ;;  %v659_v36 = vadd.f32 %v658_v33, %v557_v17  ;;  %v676_v38 = vmax.f32 %v665_v26, 0.0  ;;  %v669_v39 = vadd.f32 %v668_v34, %v567_v16 }
 0x211   : > { %v683_v37 = vshrl.u32 %v671_v29, 16  ;;  %v713_v40 = vshrl.u32 %v675_v30, 16  ;;  %v673_v41 = vmax.f32 %v657_v31, 0.0  ;;  %v677_v42 = vmax.f32 %v667_v32, 0.0 }
 0x212   : > { %v684_v43 = vshrl.u32 %v672_v35, 16  ;;  %v674_v44 = vmax.f32 %v659_v36, 0.0  ;;  %v714_v46 = vshrl.u32 %v676_v38, 16  ;;  %v678_v48 = vmax.f32 %v669_v39, 0.0 }
 0x213   : > { %v685_v45 = vand.u32 1, %v683_v37  ;;  %v695_v47 = vshrl.u32 %v673_v41, 16  ;;  %v681_v49 = vadd.s32 32767, %v671_v29  ;;  %v715_v50 = vand.u32 1, %v713_v40 }
 0x214   : > { %v725_v51 = vshrl.u32 %v677_v42, 16  ;;  %v711_v52 = vadd.s32 32767, %v675_v30  ;;  %v682_v53 = vadd.s32 32767, %v672_v35  ;;  %v693_v54 = vadd.s32 32767, %v673_v41 }
 0x215   : > { %v697_v55 = vand.u32 1, %v695_v47  ;;  %v686_v56 = vand.u32 1, %v684_v43  ;;  %v723_v57 = vadd.s32 32767, %v677_v42  ;;  %v696_v59 = vshrl.u32 %v674_v44, 16 }
 0x216   : > { %v727_v58 = vand.u32 1, %v725_v51  ;;  %v687_v60 = vadd.s32 %v685_v45, %v681_v49  ;;  %v716_v61 = vand.u32 1, %v714_v46  ;;  %v726_v63 = vshrl.u32 %v678_v48, 16 }
 0x217   : > { %v699_v62 = vadd.s32 %v697_v55, %v693_v54  ;;  %v717_v0 = vadd.s32 %v715_v50, %v711_v52  ;;  %v694_v2 = vadd.s32 32767, %v674_v44  ;;  %v698_v3 = vand.u32 1, %v696_v59 }
 0x218   : > { %v729_v1 = vadd.s32 %v727_v58, %v723_v57  ;;  %v712_v4 = vadd.s32 32767, %v676_v38  ;;  %v724_v6 = vadd.s32 32767, %v678_v48  ;;  %v728_v7 = vand.u32 1, %v726_v63 }
 0x219   : > { %v701_v5 = vshrl.u32 %v699_v62, 16  ;;  %v688_v8 = vadd.s32 %v686_v56, %v682_v53  ;;  %v700_v10 = vadd.s32 %v698_v3, %v694_v2  ;;  %v689_v11 = vshrl.u32 %v687_v60, 16 }
 0x21a   : > { %v731_v9 = vshrl.u32 %v729_v1, 16  ;;  %v718_v13 = vadd.s32 %v716_v61, %v712_v4  ;;  %v730_v15 = vadd.s32 %v728_v7, %v724_v6  ;;  %v719_v16 = vshrl.u32 %v717_v0, 16 }
 0x21b   : > { %v703_v14 = vshll.u32 %v701_v5, 16  ;;  %v702_v18 = vshrl.u32 %v700_v10, 16  ;;  %v690_v12 = vshrl.u32 %v688_v8, 16 }
 0x21c   : > { %v733_v17 = vshll.u32 %v731_v9, 16  ;;  %v732_v20 = vshrl.u32 %v730_v15, 16  ;;  %v720_v23 = vshrl.u32 %v718_v13, 16 }
 0x21d   : > { %v705_v19 = vor.u32 %v703_v14, %v689_v11  ;;  %v704_v22 = vshll.u32 %v702_v18, 16 }
 0x21e   : > { %v735_v21 = vor.u32 %v733_v17, %v719_v16  ;;  %v734_v24 = vshll.u32 %v732_v20, 16 }
 0x21f   : > { %707 = vst [vmem:[%s170_s22] sm:$0xff] %v705_v19  ;;  %v706_v25 = vor.u32 %v704_v22, %v690_v12 }
 0x220   : > { %819 = vst [vmem:[%s170_s22 + $0x10] sm:$0xff] %v735_v21  ;;  %v736_v26 = vor.u32 %v734_v24, %v720_v23 }
 0x221   : > { %708 = vst [vmem:[%s170_s22 + $0x8] sm:$0xff] %v706_v25 }
 0x222   : > { %820 = vst [vmem:[%s170_s22 + $0x18] sm:$0xff] %v736_v26 }
 0x223 PF: > { %s13_s12 = sadd.s32 1, %s878_s12  }
 0x224   : > { %p10_p4 = scmp.ge.s32.totalorder %s13_s12, 4  }
 0x226   :  { %12 = sbr.rel (!%p10_p4) target bundleno = 1 (0x1), region = 63 }

</bundles_post_ra>
